<compile_context>
chip_gen: v6e
topology: v6e:2x2x1
jax: 0.10.0
libtpu: 0.0.40
codegen_flags: <defaults>
</compile_context>

<pallas_src>
import math

import jax
import jax.numpy as jnp
from jax.experimental import pallas as pl
from jax.experimental.pallas import tpu as pltpu


def _round_up(x, m):
    return ((x + m - 1) // m) * m


# ----------------------------------------------------------------------------
# Encoder matmul kernel (tiled over rows, bf16 inputs, f32 accumulation)
# ----------------------------------------------------------------------------

def _matmul_relu_kernel(a_ref, b_ref, o_ref):
    o_ref[...] = jnp.maximum(
        jnp.dot(a_ref[...], b_ref[...], preferred_element_type=jnp.float32), 0.0
    ).astype(o_ref.dtype)


def matmul_relu(a, b, out_dtype=jnp.bfloat16, tile_m=256):
    M, K = a.shape
    K2, N = b.shape
    assert K == K2
    tm = min(tile_m, M)
    return pl.pallas_call(
        _matmul_relu_kernel,
        out_shape=jax.ShapeDtypeStruct((M, N), out_dtype),
        grid=(pl.cdiv(M, tm),),
        in_specs=[
            pl.BlockSpec((tm, K), lambda i: (i, 0)),
            pl.BlockSpec((K, N), lambda i: (0, 0)),
        ],
        out_specs=pl.BlockSpec((tm, N), lambda i: (i, 0)),
        compiler_params=pltpu.CompilerParams(dimension_semantics=("parallel",)),
    )(a, b)


# ----------------------------------------------------------------------------
# Fused per-batch kernel: counting convs + SmoothL1 + attention decoder + CE
# ----------------------------------------------------------------------------

def _make_can_step_kernel(Hf, Wf, C, Cout, Cp, V, Vp, L, E):
    Wp = Wf + 4               # width padded by 2 on each side (5x5 reach)
    Nc = Hf * Wp              # rows of the valid "band"
    band = 3 * Wp             # first band row inside the (Hf+6, Wp) padded grid
    inv_sqrt_c = 1.0 / math.sqrt(C)

    def kernel(feat_ref, mask_ref, clab_ref, emb_ref, lab_ref,
               w3_ref, w5_ref, wq_ref, we_ref, wc_ref, wv_ref,
               counts_ref, closs_ref, logit_ref, ce_ref):
        mask = mask_ref[...]                                   # (1, Nc) f32

        # ---- counting branch: 3x3 / 5x5 conv as shifted MXU matmuls (VMEM only)
        acc3 = jnp.zeros((Nc, Cp), jnp.float32)
        acc5 = jnp.zeros((Nc, Cp), jnp.float32)
        for di in range(5):
            for dj in range(5):
                off = band + (di - 2) * Wp + (dj - 2)
                s = feat_ref[pl.ds(off, Nc), :]                # (Nc, C) bf16
                w5b = w5_ref[pl.ds((di * 5 + dj) * C, C), :]   # (C, Cp) bf16
                acc5 = acc5 + jnp.dot(s, w5b, preferred_element_type=jnp.float32)
                if 1 <= di <= 3 and 1 <= dj <= 3:              # 3x3 shares the slice
                    w3b = w3_ref[pl.ds(((di - 1) * 3 + (dj - 1)) * C, C), :]
                    acc3 = acc3 + jnp.dot(s, w3b, preferred_element_type=jnp.float32)

        lane = jax.lax.broadcasted_iota(jnp.int32, (1, Cp), 1)
        ch_mask = (lane < Cout).astype(jnp.float32)
        s3 = jax.nn.sigmoid(acc3)                              # f32 (EUP)
        s5 = jax.nn.sigmoid(acc5)
        # masked spatial sum on the MXU: (1, Nc) @ (Nc, Cp)
        c1 = jnp.dot(mask, s3, preferred_element_type=jnp.float32) * ch_mask
        c2 = jnp.dot(mask, s5, preferred_element_type=jnp.float32) * ch_mask
        cavg = (c1 + c2) * 0.5
        counts_ref[...] = cavg

        tgt = clab_ref[...]                                    # (1, Cp) f32 (0 in pad)

        def sl1(p):                                            # SmoothL1, beta=1.0
            d = p - tgt
            ad = jnp.abs(d)
            return jnp.where(ad < 1.0, 0.5 * d * d, ad - 0.5)

        closs_ref[...] = (sl1(c1) + sl1(c2) + sl1(cavg)) * ch_mask

        # ---- attention decoder (stand-in) with fused cross entropy ----
        emb = emb_ref[...]                                     # (L, E) bf16
        fb = feat_ref[pl.ds(band, Nc), :]                      # (Nc, C) bf16 band
        q = jnp.dot(emb, wq_ref[...], preferred_element_type=jnp.float32)   # (L, C)
        scores = jax.lax.dot_general(
            q.astype(jnp.bfloat16), fb, (((1,), (1,)), ((), ())),
            preferred_element_type=jnp.float32) * inv_sqrt_c                 # (L, Nc)
        scores = jnp.where(mask > 0.0, scores, -1e9)
        m = jnp.max(scores, axis=-1, keepdims=True)
        e = jnp.exp(scores - m)
        denom = jnp.sum(e, axis=-1, keepdims=True)
        alphas = e * pl.reciprocal(denom, approx=True)
        ctx = jnp.dot(alphas.astype(jnp.bfloat16), fb,
                      preferred_element_type=jnp.float32)                    # (L, C)
        cctx = jnp.dot(cavg.astype(jnp.bfloat16), wc_ref[...],
                       preferred_element_type=jnp.float32)                   # (1, C)
        h = jnp.tanh(jnp.dot(emb, we_ref[...], preferred_element_type=jnp.float32)
                     + ctx + cctx)                                           # (L, C)
        logits = jnp.dot(h.astype(jnp.bfloat16), wv_ref[...],
                         preferred_element_type=jnp.float32)                 # (L, Vp)
        logit_ref[...] = logits

        # per-token cross entropy over the real V classes (padded lanes masked)
        vlane = jax.lax.broadcasted_iota(jnp.int32, (L, Vp), 1)
        x = jnp.where(vlane < V, logits, -1e30)
        mx = jnp.max(x, axis=-1, keepdims=True)
        lse = mx + jnp.log(jnp.sum(jnp.exp(x - mx), axis=-1, keepdims=True))
        picked = jnp.sum(jnp.where(vlane == lab_ref[...], x, 0.0),
                         axis=-1, keepdims=True)
        ce_ref[...] = lse - picked                                           # (L, 1)

    return kernel


def can_step(feat_pad, mask_band, clabels_pad, emb, labels2d,
             w3, w5, wq, we, wc, wv, *, Hf, Wf, C, Cout, Cp, V, Vp, L, E):
    B, Np, _ = feat_pad.shape
    Nc = Hf * (Wf + 4)
    kernel = _make_can_step_kernel(Hf, Wf, C, Cout, Cp, V, Vp, L, E)
    out_shape = (
        jax.ShapeDtypeStruct((B, 1, Cp), jnp.float32),   # averaged counting preds
        jax.ShapeDtypeStruct((B, 1, Cp), jnp.float32),   # SmoothL1 loss elements
        jax.ShapeDtypeStruct((B, L, Vp), jnp.float32),   # word logits (padded vocab)
        jax.ShapeDtypeStruct((B, L, 1), jnp.float32),    # per-token CE
    )
    in_specs = [
        pl.BlockSpec((None, Np, C), lambda b: (b, 0, 0)),
        pl.BlockSpec((None, 1, Nc), lambda b: (b, 0, 0)),
        pl.BlockSpec((None, 1, Cp), lambda b: (b, 0, 0)),
        pl.BlockSpec((None, L, E), lambda b: (b, 0, 0)),
        pl.BlockSpec((None, L, 1), lambda b: (b, 0, 0)),
        pl.BlockSpec((9 * C, Cp), lambda b: (0, 0)),
        pl.BlockSpec((25 * C, Cp), lambda b: (0, 0)),
        pl.BlockSpec((E, C), lambda b: (0, 0)),
        pl.BlockSpec((E, C), lambda b: (0, 0)),
        pl.BlockSpec((Cp, C), lambda b: (0, 0)),
        pl.BlockSpec((C, Vp), lambda b: (0, 0)),
    ]
    out_specs = (
        pl.BlockSpec((None, 1, Cp), lambda b: (b, 0, 0)),
        pl.BlockSpec((None, 1, Cp), lambda b: (b, 0, 0)),
        pl.BlockSpec((None, L, Vp), lambda b: (b, 0, 0)),
        pl.BlockSpec((None, L, 1), lambda b: (b, 0, 0)),
    )
    return pl.pallas_call(
        kernel,
        out_shape=out_shape,
        grid=(B,),
        in_specs=in_specs,
        out_specs=out_specs,
        compiler_params=pltpu.CompilerParams(dimension_semantics=("parallel",)),
    )(feat_pad, mask_band, clabels_pad, emb, labels2d, w3, w5, wq, we, wc, wv)


# ----------------------------------------------------------------------------
# Plain-JAX glue (counting labels)
# ----------------------------------------------------------------------------

def gen_counting_label(labels, channel, tag):
    # TODO(synk): the original CAN ignores a specific symbol-id list (pad/eos/etc.);
    # here only id 0 is treated as "ignore" when tag=True.
    oh = jax.nn.one_hot(labels, channel, dtype=jnp.float32)          # [B, L, C]
    if tag:
        oh = oh * (labels != 0).astype(jnp.float32)[..., None]
    return jnp.sum(oh, axis=1)                                        # [B, C]


# ----------------------------------------------------------------------------
# CAN model (parameters + forward)
# ----------------------------------------------------------------------------

def init_can_weights(key, *, img_channels, ratio, in_channel, out_channel,
                     embed_dim, vocab):
    ks = jax.random.split(key, 8)
    s = 0.05
    C = in_channel
    Cp = _round_up(out_channel, 128)
    Vp = _round_up(vocab, 128)

    def pad_cols(w, n):
        return jnp.pad(w, ((0, 0), (0, n - w.shape[1])))

    def pad_rows(w, n):
        return jnp.pad(w, ((0, n - w.shape[0]), (0, 0)))

    w_cnt3 = s * jax.random.normal(ks[1], (3 * 3 * C, out_channel), jnp.float32)
    w_cnt5 = s * jax.random.normal(ks[2], (5 * 5 * C, out_channel), jnp.float32)
    w_c = s * jax.random.normal(ks[6], (out_channel, C), jnp.float32)
    w_v = s * jax.random.normal(ks[7], (C, vocab), jnp.float32)

    return {
        # TODO(synk): CapsNet encoder definition not provided; stand-in is a single
        # strided patchify-conv (kernel=stride=ratio) + ReLU producing in_channel maps.
        "w_enc": (s * jax.random.normal(
            ks[0], (ratio * ratio * img_channels, C), jnp.float32)).astype(jnp.bfloat16),
        # TODO(synk): counting_decoder internals (512-ch trans conv + channel attention)
        # not provided; implemented as kxk conv -> sigmoid -> mask -> spatial sum.
        "w_cnt3": pad_cols(w_cnt3, Cp).astype(jnp.bfloat16),
        "w_cnt5": pad_cols(w_cnt5, Cp).astype(jnp.bfloat16),
        # TODO(synk): GRU attention decoder (AttDecoder) not provided; stand-in is a
        # teacher-forced single-layer dot-product-attention decoder fused in one kernel.
        "embed": (s * jax.random.normal(ks[3], (vocab, embed_dim), jnp.float32)).astype(jnp.bfloat16),
        "w_q": (s * jax.random.normal(ks[4], (embed_dim, C), jnp.float32)).astype(jnp.bfloat16),
        "w_e": (s * jax.random.normal(ks[5], (embed_dim, C), jnp.float32)).astype(jnp.bfloat16),
        "w_c": pad_rows(w_c, Cp).astype(jnp.bfloat16),
        "w_v": pad_cols(w_v, Vp).astype(jnp.bfloat16),
    }


def can_forward(weights, params, images, images_mask, labels, labels_mask,
                is_train=True):
    ratio = params["densenet"]["ratio"]
    C = params["counting_decoder"]["in_channel"]
    Cout = params["counting_decoder"]["out_channel"]
    use_label_mask = params["use_label_mask"]

    B, Cimg, H, W = images.shape
    L = labels.shape[1]
    Hf, Wf = H // ratio, W // ratio
    Wp = Wf + 4
    Np = (Hf + 6) * Wp
    Nc = Hf * Wp
    E = weights["embed"].shape[1]
    V = weights["embed"].shape[0]
    Vp = weights["w_v"].shape[1]
    Cp = weights["w_c"].shape[0]

    # ---------------- encoder (stand-in for CapsNet), bf16 matmul ----------------
    x = jnp.transpose(images, (0, 2, 3, 1))                       # NCHW -> NHWC
    patches = (x.reshape(B, Hf, ratio, Wf, ratio, Cimg)
                 .transpose(0, 1, 3, 2, 4, 5)
                 .reshape(B * Hf * Wf, ratio * ratio * Cimg)).astype(jnp.bfloat16)
    feat_flat = matmul_relu(patches, weights["w_enc"])            # [B*P, C] bf16
    feat_img = feat_flat.reshape(B, Hf, Wf, C)

    # one small zero-pad into the flat "band" layout consumed directly from VMEM
    # by the fused kernel (replaces the 9x / 25x HBM-materialized im2col).
    feat_pad = jnp.pad(feat_img, ((0, 0), (3, 3), (2, 2), (0, 0))).reshape(B, Np, C)

    counting_mask = images_mask[:, :, ::ratio, ::ratio]           # [B, 1, Hf, Wf]
    cmask = counting_mask.reshape(B, Hf, Wf).astype(jnp.float32)
    mask_band = jnp.pad(cmask, ((0, 0), (0, 0), (2, 2))).reshape(B, 1, Nc)

    counting_labels = gen_counting_label(labels, Cout, True)      # [B, Cout]
    clabels_pad = jnp.pad(counting_labels, ((0, 0), (0, Cp - Cout))).reshape(B, 1, Cp)

    emb = jnp.take(weights["embed"], labels, axis=0)              # [B, L, E] bf16
    labels2d = labels.reshape(B, L, 1).astype(jnp.int32)

    # ---------------- fused counting + losses + decoder + CE ----------------
    counts_pad, closs_elems, word_logits_pad, ce = can_step(
        feat_pad, mask_band, clabels_pad, emb, labels2d,
        weights["w_cnt3"], weights["w_cnt5"],
        weights["w_q"], weights["w_e"], weights["w_c"], weights["w_v"],
        Hf=Hf, Wf=Wf, C=C, Cout=Cout, Cp=Cp, V=V, Vp=Vp, L=L, E=E)

    counting_preds = counts_pad[:, 0, :Cout]                      # [B, Cout]
    counting_loss = jnp.sum(closs_elems) / float(B * Cout)        # sum of 3 mean losses

    word_probs = word_logits_pad[:, :, :V]                        # [B, L, V]
    word_loss = ce.reshape(B * L)
    if use_label_mask:
        lm = labels_mask.reshape(-1).astype(jnp.float32)
        word_average_loss = (word_loss * lm).sum() / (lm.sum() + 1e-10)
    else:
        word_average_loss = word_loss.mean()

    return word_probs, counting_preds, word_average_loss, counting_loss


# ----------------------------------------------------------------------------
# main
# ----------------------------------------------------------------------------

if __name__ == "__main__":
    params = {
        "use_label_mask": True,
        "counting_decoder": {"in_channel": 32, "out_channel": 16},
        "densenet": {"ratio": 4},
        "decoder": {"net": "AttDecoder"},
    }
    B, Cimg, H, W = 2, 1, 16, 16
    L = 8
    vocab = params["counting_decoder"]["out_channel"]  # counting classes == vocab here
    embed_dim = 16

    key = jax.random.PRNGKey(0)
    k_w, k_img, k_lab = jax.random.split(key, 3)

    weights = init_can_weights(
        k_w, img_channels=Cimg, ratio=params["densenet"]["ratio"],
        in_channel=params["counting_decoder"]["in_channel"],
        out_channel=params["counting_decoder"]["out_channel"],
        embed_dim=embed_dim, vocab=vocab)

    images = jax.random.normal(k_img, (B, Cimg, H, W), jnp.float32)
    images_mask = jnp.ones((B, 1, H, W), jnp.float32)
    images_mask = images_mask.at[1, :, :, W // 2:].set(0.0)       # partial mask
    labels = jax.random.randint(k_lab, (B, L), 0, vocab).astype(jnp.int32)
    labels_mask = jnp.ones((B, L), jnp.float32).at[1, L - 2:].set(0.0)

    word_probs, counting_preds, word_average_loss, counting_loss = can_forward(
        weights, params, images, images_mask, labels, labels_mask, is_train=True)

    jax.block_until_ready((word_probs, counting_preds,
                           word_average_loss, counting_loss))
    assert word_probs.shape == (B, L, vocab)
    assert counting_preds.shape == (B, params["counting_decoder"]["out_channel"])
    print("KERNEL_OK")
</pallas_src>

<mosaic_0001>
module attributes {stable_mosaic.version = 11 : i64} {
  func.func @_matmul_relu_kernel(%arg0: i32, %arg1: memref<32x16xbf16, #tpu.memory_space<vmem>>, %arg2: memref<16x32xbf16, #tpu.memory_space<vmem>>, %arg3: memref<32x32xbf16, #tpu.memory_space<vmem>>) attributes {dimension_semantics = [#tpu.dimension_semantics<parallel>], iteration_bounds = array<i64: 1>, scalar_prefetch = 0 : i64, scratch_operands = 0 : i64, tpu.core_type = #tpu.core_type<tc>, window_params = [{transform_indices = @transform_0, window_bounds = array<i64: 32, 16>}, {pipeline_mode = #tpu.pipeline_mode<synchronous>, transform_indices = @transform_1, window_bounds = array<i64: 16, 32>}, {transform_indices = @transform_2, window_bounds = array<i64: 32, 32>}]} {
    %c0 = arith.constant 0 : index
    %c0_0 = arith.constant 0 : index
    %0 = vector.load %arg1[%c0, %c0_0] : memref<32x16xbf16, #tpu.memory_space<vmem>>, vector<32x16xbf16>
    %c0_1 = arith.constant 0 : index
    %c0_2 = arith.constant 0 : index
    %1 = vector.load %arg2[%c0_1, %c0_2] : memref<16x32xbf16, #tpu.memory_space<vmem>>, vector<16x32xbf16>
    %cst = arith.constant dense<0.000000e+00> : vector<32x32xf32>
    %2 = tpu.matmul %0, %1, %cst {dimension_numbers = #tpu.dot_dimension_numbers<[1], [0], [0], [1], [0, 0, 1, 1], [], []>} : vector<32x16xbf16>, vector<16x32xbf16>, vector<32x32xf32> -> vector<32x32xf32>
    %cst_3 = arith.constant 0.000000e+00 : f32
    %3 = vector.broadcast %cst_3 : f32 to vector<32x32xf32>
    %4 = arith.maximumf %2, %3 : vector<32x32xf32>
    %5 = arith.truncf %4 : vector<32x32xf32> to vector<32x32xbf16>
    %c0_4 = arith.constant 0 : index
    %c0_5 = arith.constant 0 : index
    %6 = vector.load %arg3[%c0_4, %c0_5] : memref<32x32xbf16, #tpu.memory_space<vmem>>, vector<32x32xbf16>
    tpu.vector_store %arg3[%c0_4, %c0_5], %5 {strides = array<i32>} : memref<32x32xbf16, #tpu.memory_space<vmem>>, vector<32x32xbf16>,
    return
  }
  func.func @transform_0(%arg0: i32) -> (i32, i32) {
    %c0_i32 = arith.constant 0 : i32
    %c0_i32_0 = arith.constant 0 : i32
    return %arg0, %c0_i32 : i32, i32
  }
  func.func @transform_1(%arg0: i32) -> (i32, i32) {
    %c0_i32 = arith.constant 0 : i32
    %c0_i32_0 = arith.constant 0 : i32
    %c0_i32_1 = arith.constant 0 : i32
    return %c0_i32, %c0_i32_0 : i32, i32
  }
  func.func @transform_2(%arg0: i32) -> (i32, i32) {
    %c0_i32 = arith.constant 0 : i32
    %c0_i32_0 = arith.constant 0 : i32
    return %arg0, %c0_i32 : i32, i32
  }
}

</mosaic_0001>

<bundles_post_ra>
// kernel: tpu_custom_call.1
= control target key start
LH: loop header
LB: loop body
LE: loop exit
PB: predicated region body
PF: predicated region fallthrough
CT: control target
= control target key end

     0   :  { %vm35_vm0 = vcmask 130048   ;;  %s216_s0 = inlined_call_operand.vmem [shape: bf16[32,16], index: 0, kind: input, shape index: {}]   ;;  %s217_s1 = inlined_call_operand.vmem [shape: bf16[16,32], index: 1, kind: input, shape index: {}]   ;;  %s218_s2 = inlined_call_operand.hbm [shape: bf16[32,32], index: 2, kind: output, shape index: {}]  }
   0x1   :  { %v157_v0 = vld [vmem:[%s217_s1] sm:$0xff]   ;;  %v159_v2 = vld [vmem:[%s216_s0 + $0x8] sm:$0xff]  }
   0x2   :  { %v158_v1 = vld [vmem:[%s216_s0] sm:$0xff]   ;;  %148 = vmatprep.subr.bf16.mxu0 %v157_v0 }
   0x3   :  { %149 = vmatpush3.bf16.msra.mxu0 %v157_v0  ;;  %150 = vmatprep.mubr.msk.bf16.mxu0 %vm35_vm0, %v158_v1 }
   0x4   :  { %7 = vsyncpa [#allocation3], 0  ;;  %vm111_vm1 = vcmask 257024   ;;  %s182_s1 = smov [#allocation2]  }
   0x5   :  { %s121_s15 = sshll.u32 %s182_s1, 4  ;;  %s122_s15 = int_to_ptr.vmem [resolvable:$true] %s121_s15 }
   0x6   :  { %151 = vmatmul.mubr.msk.bf16.vlgmr.msra.gmra.mxu0 %vm35_vm0, %v159_v2  ;;  %s160_s0 = scalar_lea.vmem %s122_s15, 256  ;;  %p165_p1 = scmp.lt.s32.totalorder %s122_s15, %s122_s15 }
   0x7   :  { %p161_p0 = scmp.ne.s32.totalorder %s122_s15, %s160_s0  ;;  %p166_p2 = scmp.lt.s32.totalorder %s160_s0, %s160_s0 }
   0x9   :  { %p167_p3 = por %p166_p2, %p165_p1 }
   0xb   :  { %p168_p4 = pnand %p167_p3, %p161_p0 }
  0xc6   :  { %v152_v3 = vpop.f32.mrf.mxu0 }
  0xc7   :  { %v93_v4 = vmax.f32 %v152_v3, 0.0 }
  0xc8   :  { %v76_v5 = vpop.f32.mrf.mxu0 }
  0xc9   :  { %v143_v6 = vpack.c.bf16 %v93_v4, %v93_v4  ;;  %v91_v7 = vmax.f32 %v76_v5, 0.0 }
  0xca   :  { %v153_v8 = vpop.f32.mrf.mxu0 }
  0xcb   :  { %114 = vst.msk [vmem:[#allocation2 + $0x8] sm:$0xf] %vm111_vm1, %v143_v6  ;;  %v141_v9 = vpack.c.bf16 %v91_v7, %v91_v7  ;;  %v94_v10 = vmax.f32 %v153_v8, 0.0 }
  0xcc   :  { %v79_v11 = vpop.f32.mrf.mxu0 }
  0xcd   :  { %112 = vst.msk [vmem:[#allocation2] sm:$0xf] %vm111_vm1, %v141_v9  ;;  %v144_v12 = vpack.c.bf16 %v94_v10, %v94_v10  ;;  %v92_v13 = vmax.f32 %v79_v11, 0.0 }
  0xcf   :  { %115 = vst.msk [vmem:[#allocation2 + $0xc] sm:$0xf] %vm111_vm1, %v144_v12  ;;  %v142_v14 = vpack.c.bf16 %v92_v13, %v92_v13 }
  0xd1   :  { %113 = vst.msk [vmem:[#allocation2 + $0x4] sm:$0xf] %vm111_vm1, %v142_v14 }
  0xd2   :  { %171 = shalt.err (!%p168_p4)
}
  0xd3   :  { %s183_s16 = smov 64   ;;  %s184_s17 = smov 4  }
  0xd4   :  { %127 = dma.vmem_to_hbm [thread:$0]  %s122_s15, 256, %s218_s2, [#allocation3], %s183_s16, %s183_s16, %s184_s17  }
  0xd5   :  { %180 = dma.done.wait [#allocation3], 256  }
  0xd6   :  { %181 = vsyncadd [#allocation3], 4294967040 }
  0xd7   :  { %131 = vsyncpa [#allocation3], 1 }

</bundles_post_ra>
